<compile_context>
chip_gen: v7x
topology: tpu7x:2x2x1
jax: 0.10.0
libtpu: 0.0.40
codegen_flags: <defaults>
</compile_context>

<pallas_src>
import jax
import jax.numpy as jnp
from jax.experimental import pallas as pl
from jax.experimental.pallas import tpu as pltpu


def _softplus(z):
    # numerically-stable softplus, matches torch.nn.functional.softplus(beta=1)
    return jnp.maximum(z, 0.0) + jnp.log1p(jnp.exp(-jnp.abs(z)))


def beta_head_kernel(x_ref, w_ref, b_ref, y_ref):
    x = x_ref[...]                       # [TB, D_in]
    w = w_ref[...]                       # [D_in, 2*D_out]  (VMEM-resident)
    b = b_ref[...]                       # [1,  2*D_out]    (VMEM-resident)
    y = jnp.dot(x, w, preferred_element_type=jnp.float32) + b
    # softplus over the whole lane-dense [TB, 2*D_out] tile; alpha/beta split
    # happens in the wrapper (avoids masked / unaligned partial stores).
    y_ref[...] = _softplus(y).astype(y_ref.dtype)


def _pick_batch_tile(batch: int) -> int:
    # Largest 8-aligned tile that divides the batch; fall back to whole batch.
    for tb in (512, 256, 128, 64, 32, 16, 8):
        if batch % tb == 0:
            return tb
    return batch


def independent_beta_module_forward(x, weight_t, bias):
    """Returns (alpha, beta) of the IndependentBeta distribution.

    x:        [batch, input_dim]
    weight_t: [input_dim, 2*output_dim]   (transpose of nn.Linear.weight)
    bias:     [2*output_dim]
    """
    batch, input_dim = x.shape
    two_out = weight_t.shape[1]
    out_dim = two_out // 2
    bias2d = bias.reshape(1, two_out)

    tb = _pick_batch_tile(batch)
    grid = (batch // tb,)

    # VMEM budget: double-buffered x + y tiles, resident weight + bias,
    # plus headroom. Clamp inside the 32 MiB scoped default (safe on v7x too).
    itemsize = jnp.dtype(x.dtype).itemsize
    tile_bytes = (2 * tb * input_dim * itemsize      # x double-buffer
                  + 2 * tb * two_out * itemsize      # y double-buffer
                  + input_dim * two_out * itemsize   # resident weight
                  + two_out * itemsize)              # resident bias
    vmem_limit = int(min(max(2 * tile_bytes + (4 << 20), 16 << 20), 32 << 20))

    y = pl.pallas_call(
        beta_head_kernel,
        out_shape=jax.ShapeDtypeStruct((batch, two_out), x.dtype),
        grid_spec=pl.GridSpec(
            grid=grid,
            in_specs=[
                pl.BlockSpec((tb, input_dim), lambda i: (i, 0)),
                pl.BlockSpec((input_dim, two_out), lambda i: (0, 0)),
                pl.BlockSpec((1, two_out), lambda i: (0, 0)),
            ],
            out_specs=pl.BlockSpec((tb, two_out), lambda i: (i, 0)),
        ),
        compiler_params=pltpu.CompilerParams(
            dimension_semantics=("parallel",),
            vmem_limit_bytes=vmem_limit,
        ),
    )(x, weight_t, bias2d)

    # Free XLA-level split into the two distribution parameters.
    alpha = y[:, :out_dim]
    beta = y[:, out_dim:]
    return alpha, beta


# --- plain-JAX IndependentBeta glue (min=0, max=1, event_dims=1 default) ---
# TODO(synk): sampling (Beta rsample / reparameterization) is left to plain
# JAX (jax.random.beta) outside the kernel; no Pallas equivalent needed.
def independent_beta_log_prob(alpha, beta, value, min_=0.0, max_=1.0):
    scale = max_ - min_
    eps = jnp.finfo(alpha.dtype).eps
    v = jnp.clip((value - min_) / scale, eps, 1.0 - eps)
    lp = ((alpha - 1.0) * jnp.log(v) + (beta - 1.0) * jnp.log1p(-v)
          - (jax.scipy.special.gammaln(alpha) + jax.scipy.special.gammaln(beta)
             - jax.scipy.special.gammaln(alpha + beta)))
    return lp.sum(axis=-1)   # event_dims=1


if __name__ == "__main__":
    key = jax.random.PRNGKey(0)
    batch, input_dim, output_dim = 8, 32, 8

    kx, kw, kb = jax.random.split(key, 3)
    # deterministic nn.Linear-style init: U(-1/sqrt(in), 1/sqrt(in))
    bound = 1.0 / (input_dim ** 0.5)
    weight = jax.random.uniform(kw, (2 * output_dim, input_dim),
                                jnp.float32, -bound, bound)   # nn.Linear.weight
    bias = jax.random.uniform(kb, (2 * output_dim,),
                              jnp.float32, -bound, bound)     # nn.Linear.bias
    x = jax.random.normal(kx, (batch, input_dim), jnp.float32)

    alpha, beta = independent_beta_module_forward(x, weight.T, bias)
    jax.block_until_ready((alpha, beta))

    # reference check in plain JAX
    y_ref = x @ weight.T + bias
    a_ref = jax.nn.softplus(y_ref[:, :output_dim])
    b_ref = jax.nn.softplus(y_ref[:, output_dim:])
    assert jnp.allclose(alpha, a_ref, atol=1e-5), "alpha mismatch"
    assert jnp.allclose(beta, b_ref, atol=1e-5), "beta mismatch"

    # exercise the distribution glue once
    lp = independent_beta_log_prob(alpha, beta,
                                   jnp.full((batch, output_dim), 0.5))
    jax.block_until_ready(lp)

    print("KERNEL_OK")
</pallas_src>

<mosaic_0001>
module attributes {stable_mosaic.version = 11 : i64} {
  func.func @beta_head_kernel(%arg0: i32, %arg1: memref<8x32xf32, #tpu.memory_space<vmem>>, %arg2: memref<32x16xf32, #tpu.memory_space<vmem>>, %arg3: memref<1x16xf32, #tpu.memory_space<vmem>>, %arg4: memref<8x16xf32, #tpu.memory_space<vmem>>) attributes {dimension_semantics = [#tpu.dimension_semantics<parallel>], iteration_bounds = array<i64: 1>, scalar_prefetch = 0 : i64, scratch_operands = 0 : i64, tpu.core_type = #tpu.core_type<tc>, window_params = [{transform_indices = @transform_0, window_bounds = array<i64: 8, 32>}, {pipeline_mode = #tpu.pipeline_mode<synchronous>, transform_indices = @transform_1, window_bounds = array<i64: 32, 16>}, {pipeline_mode = #tpu.pipeline_mode<synchronous>, transform_indices = @transform_2, window_bounds = array<i64: 1, 16>}, {transform_indices = @transform_3, window_bounds = array<i64: 8, 16>}]} {
    %c0 = arith.constant 0 : index
    %c0_0 = arith.constant 0 : index
    %0 = vector.load %arg1[%c0, %c0_0] : memref<8x32xf32, #tpu.memory_space<vmem>>, vector<8x32xf32>
    %c0_1 = arith.constant 0 : index
    %c0_2 = arith.constant 0 : index
    %1 = vector.load %arg2[%c0_1, %c0_2] : memref<32x16xf32, #tpu.memory_space<vmem>>, vector<32x16xf32>
    %c0_3 = arith.constant 0 : index
    %c0_4 = arith.constant 0 : index
    %2 = vector.load %arg3[%c0_3, %c0_4] : memref<1x16xf32, #tpu.memory_space<vmem>>, vector<1x16xf32>
    %cst = arith.constant dense<0.000000e+00> : vector<8x16xf32>
    %3 = tpu.matmul %0, %1, %cst {dimension_numbers = #tpu.dot_dimension_numbers<[1], [0], [0], [1], [0, 0, 1, 1], [], []>} : vector<8x32xf32>, vector<32x16xf32>, vector<8x16xf32> -> vector<8x16xf32>
    %4 = vector.broadcast %2 : vector<1x16xf32> to vector<8x16xf32>
    %5 = arith.addf %3, %4 : vector<8x16xf32>
    %cst_5 = arith.constant 0.000000e+00 : f32
    %6 = vector.broadcast %cst_5 : f32 to vector<8x16xf32>
    %7 = arith.maximumf %5, %6 : vector<8x16xf32>
    %8 = math.absf %5 : vector<8x16xf32>
    %cst_6 = arith.constant 0.000000e+00 : f32
    %9 = vector.broadcast %cst_6 : f32 to vector<8x16xf32>
    %10 = arith.subf %9, %8 : vector<8x16xf32>
    %11 = math.exp %10 : vector<8x16xf32>
    %12 = math.log1p %11 : vector<8x16xf32>
    %13 = arith.addf %7, %12 : vector<8x16xf32>
    %c0_7 = arith.constant 0 : index
    %c0_8 = arith.constant 0 : index
    %14 = vector.load %arg4[%c0_7, %c0_8] : memref<8x16xf32, #tpu.memory_space<vmem>>, vector<8x16xf32>
    tpu.vector_store %arg4[%c0_7, %c0_8], %13 {strides = array<i32>} : memref<8x16xf32, #tpu.memory_space<vmem>>, vector<8x16xf32>,
    return
  }
  func.func @transform_0(%arg0: i32) -> (i32, i32) {
    %c0_i32 = arith.constant 0 : i32
    %c0_i32_0 = arith.constant 0 : i32
    return %arg0, %c0_i32 : i32, i32
  }
  func.func @transform_1(%arg0: i32) -> (i32, i32) {
    %c0_i32 = arith.constant 0 : i32
    %c0_i32_0 = arith.constant 0 : i32
    %c0_i32_1 = arith.constant 0 : i32
    return %c0_i32, %c0_i32_0 : i32, i32
  }
  func.func @transform_2(%arg0: i32) -> (i32, i32) {
    %c0_i32 = arith.constant 0 : i32
    %c0_i32_0 = arith.constant 0 : i32
    %c0_i32_1 = arith.constant 0 : i32
    return %c0_i32, %c0_i32_0 : i32, i32
  }
  func.func @transform_3(%arg0: i32) -> (i32, i32) {
    %c0_i32 = arith.constant 0 : i32
    %c0_i32_0 = arith.constant 0 : i32
    return %arg0, %c0_i32 : i32, i32
  }
}

</mosaic_0001>

<bundles_post_ra>
// kernel: tpu_custom_call.1
= control target key start
LH: loop header
LB: loop body
LE: loop exit
PB: predicated region body
PF: predicated region fallthrough
CT: control target
= control target key end

     0   :  { %v188_v3 = vmov 0.0|0.0   ;;  %vm189_vm0 = vmmov 0   ;;  %v190_v6 = vmov 0.0   ;;  %s242_s0 = inlined_call_operand.vmem [shape: f32[8,32], index: 0, kind: input, shape index: {}]   ;;  %s243_s1 = inlined_call_operand.vmem [shape: f32[32,16], index: 1, kind: input, shape index: {}]   ;;  %s244_s2 = inlined_call_operand.vmem [shape: f32[1,16], index: 2, kind: input, shape index: {}]   ;;  %s245_s3 = inlined_call_operand.hbm [shape: f32[8,16], index: 3, kind: output, shape index: {}]  }
   0x1   :  { %v16_v0 = vld [vmem:[%s243_s1] sm:$0xff]  ;;  %v17_v1 = vld [vmem:[%s243_s1 + $0x8] sm:$0xff]  ;;  %v18_v2 = vld [vmem:[%s243_s1 + $0x10] sm:$0xff]  ;;  %150 = vmatprep.subr.bf16.mxu0 %v188_v3  ;;  %147 = vmatprep.mubr.msk.f32.mxu0 %vm189_vm0, %v190_v6 }
   0x2   :  { %v151_v4 = vpack.c.bf16 %v17_v1, %v16_v0  ;;  %v19_v5 = vld [vmem:[%s243_s1 + $0x18] sm:$0xff] }
   0x3   :  { %8 = vsyncpa [#allocation3], 0  ;;  %v154_v7 = vpack.c.bf16 %v19_v5, %v18_v2  ;;  %v15_v8 = vld [vmem:[%s242_s0] sm:$0xff]  ;;  %vm27_vm1 = vcmask 261120   ;;  %s191_s0 = smov [#allocation2]   ;;  %vm116_vm3 = vcmask 130048  }
   0x4   :  { %152 = vmatpush3.bf16.msra.mxu0 %v151_v4  ;;  %v132_v9 = vld [vmem:[%s244_s2] ss:$0 sm:$0xff]  ;;  %s124_s1 = sshll.u32 %s191_s0, 4  ;;  %s125_s1 = int_to_ptr.vmem [resolvable:$true] %s124_s1 }
   0x5   :  { %153 = vmatprep.subr.bf16.mxu0 %v188_v3  ;;  %s164_s2 = scalar_lea.vmem %s125_s1, 128  ;;  %p169_p1 = scmp.lt.s32.totalorder %s125_s1, %s125_s1 }
   0x6   :  { %p165_p0 = scmp.ne.s32.totalorder %s125_s1, %s164_s2  ;;  %p170_p2 = scmp.lt.s32.totalorder %s164_s2, %s164_s2 }
   0x8   :  { %155 = vmatpush3.bf16.msra.mxu0 %v154_v7  ;;  %p171_p3 = por %p170_p2, %p169_p1 }
   0xa   :  { %p172_p4 = pnand %p171_p3, %p165_p0 }
   0xb   :  { %148 = vmatmul.mubr.msk.f32.vlgmr.msra.gmra.mrb[0].mxu0 %vm27_vm1, %v15_v8 }
  0xde   :  { %v97_v10 = vpop.f32.mrb[0].mxu0 }
  0xdf   :  { %v98_v11 = vadd.f32 %v132_v9, %v97_v10  ;;  %v149_v12 = vpop.f32.mrb[1].mxu0 }
  0xe1   :  { %v102_v13 = vand.u32 2147483647, %v98_v11  ;;  %v101_v24 = vmax.f32 %v98_v11, 0.0 }
  0xe3   :  { %v103_v14 = vsub.f32 0.0, %v102_v13 }
  0xe5   :  { %v104_v15 = vmul.f32 1.442695, %v103_v14 }
  0xe7   :  { %160 = vpow2.f32 %v104_v15 }
  0xf1   :  { %v161_v16 = vpop.eup %160 }
  0xf2   :  { %v106_v17 = vadd.f32 1.0, %v161_v16  ;;  %v109_v18 = vmul.f32 -0.5, %v161_v16  ;;  %v112_v20 = vand.u32 2147483647, %v161_v16 }
  0xf4   :  { %162 = vlog2.f32 %v106_v17  ;;  %v110_v19 = vadd.f32 1.0, %v109_v18  ;;  %vm113_vm2 = vcmp.lt.f32.partialorder %v112_v20, 0.0004427343 }
  0xf6   :  { %v111_v23 = vmul.f32 %v161_v16, %v110_v19 }
  0xfe   :  { %v163_v21 = vpop.eup %162 }
  0xff   :  { %v108_v22 = vmul.f32 0.6931472, %v163_v21 }
 0x101   :  { %v114_v25 = vsel %vm113_vm2, %v111_v23, %v108_v22 }
 0x102   :  { %v115_v26 = vadd.f32 %v114_v25, %v101_v24 }
 0x104   :  { %117 = vst.msk [vmem:[#allocation2] sm:$0xff] %vm116_vm3, %v115_v26 }
 0x105   :  { %175 = shalt.err (!%p172_p4)
}
 0x106   :  { %s176_s26 = scalar_lea.hbm %s245_s3, 128 }
 0x107   :  { %p177_p5 = scmp.ne.s32.totalorder %s245_s3, %s176_s26  ;;  %p180_p6 = scmp.lt.u32.totalorder %s176_s26, %s245_s3 }
 0x109   :  { %p182_p7 = pnand %p180_p6, %p177_p5 }
 0x10b   :  { %185 = shalt.err (!%p182_p7)
}
 0x10c   :  { %127 = dma.vmem_to_hbm [thread:$0]  %s125_s1, 128, %s245_s3, [#allocation3]  }
 0x10d   :  { %186 = dma.done.wait [#allocation3], 128  }
 0x10e   :  { %187 = vsyncadd [#allocation3], 4294967168 }
 0x10f   :  { %131 = vsyncpa [#allocation3], 1 }

</bundles_post_ra>
